<compile_context>
chip_gen: v5e
topology: v5e:2x2
jax: 0.10.0
libtpu: 0.0.40
codegen_flags: <defaults>
</compile_context>

<pallas_src>
import functools

import jax
import jax.numpy as jnp
from jax.experimental import pallas as pl
from jax.experimental.pallas import tpu as pltpu


def _round_up(x: int, m: int) -> int:
    return ((x + m - 1) // m) * m


def _pick_tk(din_pad: int, budget: int) -> int:
    """Largest 128-multiple <= budget that divides din_pad (avoids K over-padding)."""
    d = din_pad // 128
    best = 1
    for f in range(1, d + 1):
        if d % f == 0 and 128 * f <= budget:
            best = f
    return 128 * best


def _epilogue(logits, activation: str, dout_valid: int):
    """Activation on f32 logits (bias already added)."""
    if activation == "softmax":
        # Mask lane-padded class columns so they don't pollute the normalizer.
        if dout_valid < logits.shape[-1]:
            col = jax.lax.broadcasted_iota(jnp.int32, logits.shape, 1)
            logits = jnp.where(col < dout_valid, logits, -jnp.inf)
        m = jnp.max(logits, axis=-1, keepdims=True)
        e = jnp.exp(logits - m)
        denom = jnp.sum(e, axis=-1, keepdims=True)
        return e * pl.reciprocal(denom, approx=True)   # EUP slot, ~free
    if activation == "sigmoid":
        return jax.nn.sigmoid(logits)
    return logits


def _head_kernel_fullk(x_ref, w_ref, b_ref, o_ref, *, activation: str, dout_valid: int):
    """Weight-resident path: grid=(nb,), single dot, no accumulator scratch.

    x_ref: (TB, Din_pad)   w_ref: (Din_pad, DOUT_PAD)   b_ref: (1, DOUT_PAD)
    o_ref: (TB, DOUT_PAD)
    """
    logits = jnp.dot(x_ref[...], w_ref[...], preferred_element_type=jnp.float32)
    logits = logits + b_ref[...].astype(jnp.float32)
    o_ref[...] = _epilogue(logits, activation, dout_valid).astype(o_ref.dtype)


def _head_kernel_ktiled(x_ref, w_ref, b_ref, o_ref, acc_ref, *, activation: str,
                        dout_valid: int):
    """K-tiled path for very large Din: grid=(nb, nk), resident f32 accumulator.

    x_ref: (TB, TK)   w_ref: (TK, DOUT_PAD)   b_ref: (1, DOUT_PAD)
    o_ref: (TB, DOUT_PAD)   acc_ref: (TB, DOUT_PAD) f32
    """
    k = pl.program_id(1)

    @pl.when(k == 0)
    def _():
        acc_ref[...] = jnp.zeros_like(acc_ref)

    acc_ref[...] += jnp.dot(x_ref[...], w_ref[...],
                            preferred_element_type=jnp.float32)

    @pl.when(k == pl.num_programs(1) - 1)
    def _():
        logits = acc_ref[...] + b_ref[...].astype(jnp.float32)
        o_ref[...] = _epilogue(logits, activation, dout_valid).astype(o_ref.dtype)


def classification_head_forward(x, weight, bias, *, pool_seq=True,
                                output_probabilities=False,
                                max_resident_k=4096):
    """JAX/Pallas equivalent of ClassificationHead.forward.

    x      : (B, S, Din) if pool_seq else (B, Din)
    weight : (Dout, Din)   (PyTorch nn.Linear convention)
    bias   : (Dout,)
    returns: (B, Dout) in x.dtype
    """
    if pool_seq:
        B, S, Din = x.shape
    else:
        B, Din = x.shape
    Dout = weight.shape[0]

    if output_probabilities and Dout > 1:
        activation = "softmax"
    elif output_probabilities and Dout == 1:
        activation = "sigmoid"
    else:
        activation = "none"

    # --- Tiling (lane-dense 128-wide output, sublane-pack-aligned batch tiles) ---
    itemsize = jnp.dtype(x.dtype).itemsize
    pack = max(8, 32 // itemsize)            # 8 f32, 16 bf16, 32 int8/fp8

    Din_pad = _round_up(Din, 128)
    DOUT_PAD = _round_up(Dout, 128)
    # TODO(synk): vocab-sized Dout would additionally need an N-tiled grid with a
    # cross-tile softmax; not needed for a classification head.

    B_pad = _round_up(B, pack)
    TB = min(512, B_pad)
    # Give the 'parallel' batch axis >= 2 blocks when the batch is big enough:
    # lets v7x shard across its two TensorCores (negligible cost on v5e/v6e).
    if B_pad // TB == 1 and B_pad >= 2 * pack:
        TB = _round_up(B_pad // 2, pack)
    B_pad = _round_up(B_pad, TB)
    nb = B_pad // TB

    full_k = Din_pad <= max_resident_k
    if full_k:
        TK, nk = Din_pad, 1
    else:
        TK = _pick_tk(Din_pad, min(2048, max_resident_k))
        nk = Din_pad // TK

    # --- Input pooling / padding ---
    needs_x_pad = (B_pad != B) or (Din_pad != Din)
    pool_in_kernel = pool_seq and not needs_x_pad
    if pool_seq and not pool_in_kernel:
        # Padding is needed anyway: pool in the wrapper so only the (B, Din)
        # token-0 slice is padded, never the full (B, S, Din) tensor.
        x = x[:, 0, :]
    if not pool_in_kernel and needs_x_pad:
        x = jnp.pad(x, ((0, B_pad - B), (0, Din_pad - Din)))

    # Weight/bias prep: one transpose+pad per call. For repeated inference hoist
    # this (precompute the (Din_pad, DOUT_PAD) tensor at init); under jit with
    # constant params XLA folds it.
    w_t = weight.T                                        # (Din, Dout): K on sublanes
    if (Din_pad, DOUT_PAD) != (Din, Dout):
        w_t = jnp.pad(w_t, ((0, Din_pad - Din), (0, DOUT_PAD - Dout)))
    b2d = bias.reshape(1, Dout)
    if DOUT_PAD != Dout:
        b2d = jnp.pad(b2d, ((0, 0), (0, DOUT_PAD - Dout)))

    # --- Specs / kernel selection ---
    if full_k:
        kernel = functools.partial(_head_kernel_fullk, activation=activation,
                                   dout_valid=Dout)
        grid = (nb,)
        if pool_in_kernel:
            # Squeezed seq dim: kernel ref is (TB, Din_pad); only token-0 rows DMA'd.
            x_spec = pl.BlockSpec((TB, pl.Squeezed(), Din_pad), lambda i: (i, 0, 0))
        else:
            x_spec = pl.BlockSpec((TB, Din_pad), lambda i: (i, 0))
        w_spec = pl.BlockSpec((Din_pad, DOUT_PAD), lambda i: (0, 0))   # resident
        b_spec = pl.BlockSpec((1, DOUT_PAD), lambda i: (0, 0))
        o_spec = pl.BlockSpec((TB, DOUT_PAD), lambda i: (i, 0))
        scratch = []
        dims = ("parallel",)
    else:
        kernel = functools.partial(_head_kernel_ktiled, activation=activation,
                                   dout_valid=Dout)
        grid = (nb, nk)
        if pool_in_kernel:
            x_spec = pl.BlockSpec((TB, pl.Squeezed(), TK), lambda i, k: (i, 0, k))
        else:
            x_spec = pl.BlockSpec((TB, TK), lambda i, k: (i, k))
        w_spec = pl.BlockSpec((TK, DOUT_PAD), lambda i, k: (k, 0))
        b_spec = pl.BlockSpec((1, DOUT_PAD), lambda i, k: (0, 0))
        o_spec = pl.BlockSpec((TB, DOUT_PAD), lambda i, k: (i, 0))
        scratch = [pltpu.VMEM((TB, DOUT_PAD), jnp.float32)]
        dims = ("parallel", "arbitrary")

    # VMEM budget from the actual tile footprint; 48 MiB cap is safe on v7x's
    # 64 MiB and well within v5e/v6e's 128 MiB.
    w_isz = jnp.dtype(w_t.dtype).itemsize
    vmem_est = (2 * TB * TK * itemsize            # x double buffer
                + 2 * TK * DOUT_PAD * w_isz       # weight double buffer
                + 2 * TB * DOUT_PAD * itemsize    # output double buffer
                + 2 * 8 * DOUT_PAD * jnp.dtype(b2d.dtype).itemsize
                + (0 if full_k else TB * DOUT_PAD * 4))
    vmem_limit = int(min(48 << 20, max(32 << 20, int(vmem_est * 1.5))))

    cost = pl.CostEstimate(
        flops=2 * B * Din * Dout,
        transcendentals=(B * Dout) if activation != "none" else 0,
        bytes_accessed=(B * Din + Din * Dout + B * Dout) * itemsize,
    )

    out_padded = pl.pallas_call(
        kernel,
        out_shape=jax.ShapeDtypeStruct((B_pad, DOUT_PAD), x.dtype),
        grid=grid,
        in_specs=[x_spec, w_spec, b_spec],
        out_specs=o_spec,
        scratch_shapes=scratch,
        compiler_params=pltpu.CompilerParams(
            dimension_semantics=dims,
            vmem_limit_bytes=vmem_limit,
        ),
        cost_estimate=cost,
    )(x, w_t, b2d)

    return out_padded[:B, :Dout]


if __name__ == "__main__":
    key = jax.random.PRNGKey(0)

    # --- Case 1: small shapes (batch=2, seq=8, hidden=32, classes=8) -----------
    B, S, Din, Dout = 2, 8, 32, 8
    kx, kw, kb = jax.random.split(key, 3)
    x = jax.random.normal(kx, (B, S, Din), dtype=jnp.float32)
    bound = 1.0 / (Din ** 0.5)
    weight = jax.random.uniform(kw, (Dout, Din), jnp.float32, -bound, bound)
    bias = jax.random.uniform(kb, (Dout,), jnp.float32, -bound, bound)

    # Softmax path (output_probabilities=True, Dout > 1).
    out = jax.block_until_ready(classification_head_forward(
        x, weight, bias, pool_seq=True, output_probabilities=True))
    ref = jax.nn.softmax(x[:, 0] @ weight.T + bias, axis=-1)
    assert out.shape == (B, Dout)
    assert jnp.allclose(out, ref, atol=2e-3, rtol=2e-3)

    # No-activation path.
    out2 = jax.block_until_ready(classification_head_forward(
        x, weight, bias, pool_seq=True, output_probabilities=False))
    ref2 = x[:, 0] @ weight.T + bias
    assert jnp.allclose(out2, ref2, atol=1e-4, rtol=1e-4)

    # Sigmoid path (Dout == 1).
    w1, b1 = weight[:1], bias[:1]
    out3 = jax.block_until_ready(classification_head_forward(
        x, w1, b1, pool_seq=True, output_probabilities=True))
    ref3 = jax.nn.sigmoid(x[:, 0] @ w1.T + b1)
    assert jnp.allclose(out3, ref3, atol=1e-4, rtol=1e-4)

    # pool_seq=False path (x already pooled / 2-D).
    out4 = jax.block_until_ready(classification_head_forward(
        x[:, 0], weight, bias, pool_seq=False, output_probabilities=False))
    assert jnp.allclose(out4, ref2, atol=1e-4, rtol=1e-4)

    # --- Case 2: well-shaped input (no padding) -> Squeezed in-kernel pooling,
    #     2 batch blocks (TB split), weight-resident full-K path. ---------------
    B2, S2, Din2, Dout2 = 32, 4, 128, 8
    kx2, kw2, kb2 = jax.random.split(jax.random.PRNGKey(1), 3)
    x2 = jax.random.normal(kx2, (B2, S2, Din2), dtype=jnp.float32)
    w2 = jax.random.normal(kw2, (Dout2, Din2), dtype=jnp.float32) * 0.05
    b2 = jax.random.normal(kb2, (Dout2,), dtype=jnp.float32) * 0.05
    out5 = jax.block_until_ready(classification_head_forward(
        x2, w2, b2, pool_seq=True, output_probabilities=True))
    ref5 = jax.nn.softmax(x2[:, 0] @ w2.T + b2, axis=-1)
    assert jnp.allclose(out5, ref5, atol=2e-3, rtol=2e-3)

    # --- Case 3: force the K-tiled fallback (max_resident_k small). ------------
    B3, S3, Din3, Dout3 = 8, 4, 256, 4
    kx3, kw3, kb3 = jax.random.split(jax.random.PRNGKey(2), 3)
    x3 = jax.random.normal(kx3, (B3, S3, Din3), dtype=jnp.float32)
    w3 = jax.random.normal(kw3, (Dout3, Din3), dtype=jnp.float32) * 0.05
    b3 = jax.random.normal(kb3, (Dout3,), dtype=jnp.float32) * 0.05
    out6 = jax.block_until_ready(classification_head_forward(
        x3, w3, b3, pool_seq=True, output_probabilities=True, max_resident_k=128))
    ref6 = jax.nn.softmax(x3[:, 0] @ w3.T + b3, axis=-1)
    assert jnp.allclose(out6, ref6, atol=2e-3, rtol=2e-3)

    print("KERNEL_OK")
</pallas_src>

<mosaic_0001>
module attributes {stable_mosaic.version = 11 : i64} {
  func.func @_head_kernel_fullk(%arg0: i32, %arg1: memref<8x128xf32, #tpu.memory_space<vmem>>, %arg2: memref<128x128xf32, #tpu.memory_space<vmem>>, %arg3: memref<1x128xf32, #tpu.memory_space<vmem>>, %arg4: memref<8x128xf32, #tpu.memory_space<vmem>>) attributes {dimension_semantics = [#tpu.dimension_semantics<parallel>], iteration_bounds = array<i64: 1>, scalar_prefetch = 0 : i64, scratch_operands = 0 : i64, tpu.core_type = #tpu.core_type<tc>, window_params = [{transform_indices = @transform_0, window_bounds = array<i64: 8, 128>}, {pipeline_mode = #tpu.pipeline_mode<synchronous>, transform_indices = @transform_1, window_bounds = array<i64: 128, 128>}, {pipeline_mode = #tpu.pipeline_mode<synchronous>, transform_indices = @transform_2, window_bounds = array<i64: 1, 128>}, {transform_indices = @transform_3, window_bounds = array<i64: 8, 128>}]} {
    %c0 = arith.constant 0 : index
    %c0_0 = arith.constant 0 : index
    %0 = vector.load %arg1[%c0, %c0_0] : memref<8x128xf32, #tpu.memory_space<vmem>>, vector<8x128xf32>
    %c0_1 = arith.constant 0 : index
    %c0_2 = arith.constant 0 : index
    %1 = vector.load %arg2[%c0_1, %c0_2] : memref<128x128xf32, #tpu.memory_space<vmem>>, vector<128x128xf32>
    %cst = arith.constant dense<0.000000e+00> : vector<8x128xf32>
    %2 = tpu.matmul %0, %1, %cst {dimension_numbers = #tpu.dot_dimension_numbers<[1], [0], [0], [1], [0, 0, 1, 1], [], []>} : vector<8x128xf32>, vector<128x128xf32>, vector<8x128xf32> -> vector<8x128xf32>
    %c0_3 = arith.constant 0 : index
    %c0_4 = arith.constant 0 : index
    %3 = vector.load %arg3[%c0_3, %c0_4] : memref<1x128xf32, #tpu.memory_space<vmem>>, vector<1x128xf32>
    %4 = vector.broadcast %3 : vector<1x128xf32> to vector<8x128xf32>
    %5 = arith.addf %2, %4 : vector<8x128xf32>
    %6 = tpu.iota {dimensions = array<i32: 1>} : vector<8x128xi32>
    %c8_i32 = arith.constant 8 : i32
    %7 = vector.broadcast %c8_i32 : i32 to vector<8x128xi32>
    %8 = arith.cmpi slt, %6, %7 : vector<8x128xi32>
    %cst_5 = arith.constant 0xFF800000 : f32
    %9 = vector.broadcast %cst_5 : f32 to vector<8x128xf32>
    %10 = arith.select %8, %5, %9 : vector<8x128xi1>, vector<8x128xf32>
    %cst_6 = arith.constant dense<0xFF800000> : vector<8xf32>
    %11 = vector.multi_reduction <maximumf>, %10, %cst_6 [1] : vector<8x128xf32> to vector<8xf32>
    %12 = vector.shape_cast %11 : vector<8xf32> to vector<8x1xf32>
    %13 = vector.broadcast %12 : vector<8x1xf32> to vector<8x128xf32>
    %14 = arith.subf %10, %13 : vector<8x128xf32>
    %15 = math.exp %14 : vector<8x128xf32>
    %cst_7 = arith.constant dense<0.000000e+00> : vector<8xf32>
    %16 = vector.multi_reduction <add>, %15, %cst_7 [1] : vector<8x128xf32> to vector<8xf32>
    %17 = vector.shape_cast %16 : vector<8xf32> to vector<8x1xf32>
    %18 = tpu.reciprocal %17 {approx = true} : vector<8x1xf32> -> vector<8x1xf32>
    %19 = vector.broadcast %18 : vector<8x1xf32> to vector<8x128xf32>
    %20 = arith.mulf %15, %19 : vector<8x128xf32>
    %c0_8 = arith.constant 0 : index
    %c0_9 = arith.constant 0 : index
    %21 = vector.load %arg4[%c0_8, %c0_9] : memref<8x128xf32, #tpu.memory_space<vmem>>, vector<8x128xf32>
    tpu.vector_store %arg4[%c0_8, %c0_9], %20 {strides = array<i32>} : memref<8x128xf32, #tpu.memory_space<vmem>>, vector<8x128xf32>,
    return
  }
  func.func @transform_0(%arg0: i32) -> (i32, i32) {
    %c0_i32 = arith.constant 0 : i32
    %c0_i32_0 = arith.constant 0 : i32
    return %arg0, %c0_i32 : i32, i32
  }
  func.func @transform_1(%arg0: i32) -> (i32, i32) {
    %c0_i32 = arith.constant 0 : i32
    %c0_i32_0 = arith.constant 0 : i32
    %c0_i32_1 = arith.constant 0 : i32
    return %c0_i32, %c0_i32_0 : i32, i32
  }
  func.func @transform_2(%arg0: i32) -> (i32, i32) {
    %c0_i32 = arith.constant 0 : i32
    %c0_i32_0 = arith.constant 0 : i32
    %c0_i32_1 = arith.constant 0 : i32
    return %c0_i32, %c0_i32_0 : i32, i32
  }
  func.func @transform_3(%arg0: i32) -> (i32, i32) {
    %c0_i32 = arith.constant 0 : i32
    %c0_i32_0 = arith.constant 0 : i32
    return %arg0, %c0_i32 : i32, i32
  }
}

</mosaic_0001>

<bundles_post_ra>
// kernel: tpu_custom_call.1
= control target key start
LH: loop header
LB: loop body
LE: loop exit
PB: predicated region body
PF: predicated region fallthrough
CT: control target
= control target key end

     0   :  { %8 = vsyncpa [#allocation3], 0  ;;  %s243_s0 = inlined_call_operand.hbm [shape: f32[8,128], index: 0, kind: input, shape index: {}]   ;;  %s244_s1 = inlined_call_operand.hbm [shape: f32[128,128], index: 1, kind: input, shape index: {}]   ;;  %s245_s2 = inlined_call_operand.vmem [shape: f32[1,128], index: 2, kind: input, shape index: {}]   ;;  %s246_s3 = inlined_call_operand.hbm [shape: f32[8,128], index: 3, kind: output, shape index: {}]  }
   0x1   :  { %9 = vsyncpa [#allocation6], 0 }
   0x2   :  { %10 = vsyncpa [#allocation4], 0  ;;  %s16_s14 = sshll.u32 %s243_s0, 4  ;;  %s206_s15 = smov [#allocation2]   ;;  %s17_s14 = int_to_ptr.hbm [resolvable:$true] %s16_s14 }
   0x3   :  { %s18_s16 = sshll.u32 %s206_s15, 4  ;;  %s26_s19 = sshll.u32 %s244_s1, 4  ;;  %s19_s16 = int_to_ptr.vmem [resolvable:$true] %s18_s16  ;;  %s27_s19 = int_to_ptr.hbm [resolvable:$true] %s26_s19 }
   0x4   :  { %21 = dma.hbm_to_vmem [thread:$0]  %s17_s14, 128, %s19_s16, [#allocation3]  }
   0x5   :  { %s207_s20 = smov [#allocation5]   ;;  %s208_s22 = smov 128  }
   0x6   :  { %s28_s21 = sshll.u32 %s207_s20, 4  ;;  %s209_s23 = smov 8   ;;  %s29_s21 = int_to_ptr.vmem [resolvable:$true] %s28_s21 }
   0x7   :  { %34 = dma.hbm_to_vmem [thread:$0]  %s27_s19, 2048, %s29_s21, [#allocation6], %s208_s22, %s208_s22, %s209_s23  }
   0x8   :  { %200 = dma.done.wait [#allocation3], 128  }
   0x9   :  { %201 = vsyncadd [#allocation3], 4294967168 }
   0xa   :  { %202 = dma.done.wait [#allocation6], 2048  }
   0xb   :  { %203 = vsyncadd [#allocation6], 4294965248  ;;  %v61_v0 = vld [vmem:[#allocation5 + $0x78] sm:$0xff]  ;;  %v60_v1 = vld [vmem:[#allocation5 + $0x70] sm:$0xff]  ;;  %v86_v17 = vlaneseq  ;;  %s210_s24 = smov [#allocation7]   ;;  %s107_s28 = sshll.u32 %s246_s3, 4  ;;  %s108_s28 = int_to_ptr.hbm [resolvable:$true] %s107_s28 }
   0xc   :  { %66 = vmatpush.msra.mxu0 %v61_v0  ;;  %v59_v2 = vld [vmem:[#allocation5 + $0x68] sm:$0xff]  ;;  %v58_v3 = vld [vmem:[#allocation5 + $0x60] sm:$0xff]  ;;  %v57_v4 = vld [vmem:[#allocation5 + $0x58] sm:$0xff]  ;;  %s105_s25 = sshll.u32 %s210_s24, 4  ;;  %s106_s25 = int_to_ptr.vmem [resolvable:$true] %s105_s25 }
   0xd   :  { %v56_v5 = vld [vmem:[#allocation5 + $0x50] sm:$0xff]  ;;  %v55_v6 = vld [vmem:[#allocation5 + $0x48] sm:$0xff]  ;;  %v54_v7 = vld [vmem:[#allocation5 + $0x40] sm:$0xff]  ;;  %v87_v18 = vand.u32 127, %v86_v17 }
   0xe   :  { %67 = vmatpush.msra.mxu0 %v60_v1  ;;  %v53_v8 = vld [vmem:[#allocation5 + $0x38] sm:$0xff]  ;;  %v52_v9 = vld [vmem:[#allocation5 + $0x30] sm:$0xff]  ;;  %v51_v10 = vld [vmem:[#allocation5 + $0x28] sm:$0xff] }
   0xf   :  { %v50_v11 = vld [vmem:[#allocation5 + $0x20] sm:$0xff]  ;;  %v49_v12 = vld [vmem:[#allocation5 + $0x18] sm:$0xff]  ;;  %v48_v13 = vld [vmem:[#allocation5 + $0x10] sm:$0xff]  ;;  %vm88_vm0 = vcmp.lt.s32.totalorder %v87_v18, 8 }
  0x10   :  { %68 = vmatpush.msra.mxu0 %v59_v2  ;;  %v47_v14 = vld [vmem:[#allocation5 + $0x8] sm:$0xff]  ;;  %v46_v15 = vld [vmem:[#allocation5] sm:$0xff]  ;;  %v45_v16 = vld [vmem:[#allocation2] sm:$0xff] }
  0x11   :  { %v123_v19 = vld [vmem:[%s245_s2] ss:$0 sm:$0xff] }
  0x12   :  { %69 = vmatpush.msra.mxu0 %v58_v3 }
  0x14   :  { %70 = vmatpush.msra.mxu0 %v57_v4 }
  0x16   :  { %71 = vmatpush.msra.mxu0 %v56_v5 }
  0x18   :  { %72 = vmatpush.msra.mxu0 %v55_v6 }
  0x1a   :  { %73 = vmatpush.msra.mxu0 %v54_v7 }
  0x1c   :  { %74 = vmatpush.msra.mxu0 %v53_v8 }
  0x1e   :  { %75 = vmatpush.msra.mxu0 %v52_v9 }
  0x20   :  { %76 = vmatpush.msra.mxu0 %v51_v10 }
  0x22   :  { %77 = vmatpush.msra.mxu0 %v50_v11 }
  0x24   :  { %78 = vmatpush.msra.mxu0 %v49_v12 }
  0x26   :  { %79 = vmatpush.msra.mxu0 %v48_v13 }
  0x28   :  { %80 = vmatpush.msra.mxu0 %v47_v14 }
  0x2a   :  { %81 = vmatpush.msra.mxu0 %v46_v15 }
  0x2b   :  { %82 = vmatmul.f32.vlgmr.msra.gmra.mxu0 %v45_v16 }
  0xa8   :  { %v83_v20 = vpop.f32.mrf.mxu0 }
  0xa9   :  { %v84_v21 = vadd.f32 %v123_v19, %v83_v20 }
  0xab   :  { %v89_v22 = vsel %vm88_vm0, %v84_v21, -inf }
  0xac   :  { %90 = vmax.xlane.f32.xlu0 %v89_v22 }
 0x11f   :  { %v91_v23 = vpop.xlane.xlu0 %90 }
 0x120   :  { %v92_v24 = vsub.f32 %v89_v22, %v91_v23 }
 0x122   :  { %v93_v25 = vmul.f32 1.442695, %v92_v24 }
 0x124   :  { %124 = vpow2.f32 %v93_v25 }
 0x12a   :  { %v125_v26 = vpop.eup %124 }
 0x12b   :  { %95 = vadd.xlane.f32.xlu0 %v125_v26 }
 0x19e   :  { %v96_v27 = vpop.xlane.xlu0 %95 }
 0x19f   :  { %126 = vrcp.f32 %v96_v27 }
 0x1a5   :  { %v127_v28 = vpop.eup %126 }
 0x1a6   :  { %v98_v29 = vmul.f32 %v127_v28, %v125_v26 }
 0x1a8   :  { %99 = vst [vmem:[#allocation7] sm:$0xff] %v98_v29 }
 0x1a9   :  { %110 = dma.vmem_to_hbm [thread:$0]  %s106_s25, 128, %s108_s28, [#allocation4]  }
 0x1aa   :  { %204 = dma.done.wait [#allocation4], 128  }
 0x1ab   :  { %205 = vsyncadd [#allocation4], 4294967168 }
 0x1ac   :  { %115 = vsyncpa [#allocation3], 1 }
 0x1ad   :  { %116 = vsyncpa [#allocation6], 1 }
 0x1ae   :  { %117 = vsyncpa [#allocation4], 1 }

</bundles_post_ra>
